<compile_context>
chip_gen: v7x
topology: tpu7x:2x2x1
jax: 0.10.0
libtpu: 0.0.40
codegen_flags: <defaults>
</compile_context>

<pallas_src>
import functools

import jax
import jax.numpy as jnp
from jax.experimental import pallas as pl
from jax.experimental.pallas import tpu as pltpu

EPS = 1e-5  # InstanceNorm2d default eps


def _round_up(x, m):
    return ((x + m - 1) // m) * m


def _vmem_limit_bytes():
    # ~100 MiB on v5e/v6e (128 MiB physical), ~48 MiB on v7x (64 MiB physical).
    try:
        cap = int(pltpu.get_tpu_info().vmem_capacity_bytes)
    except Exception:
        cap = 64 * 1024 * 1024
    return int(min(100 * 1024 * 1024, cap * 3 // 4))


# --------------------------------------------------------------------------
# Fused path (whole HW resident): conv matmul + single-pass instance-norm +
# ReLU, accumulating directly into the output block across the K grid axis.
# --------------------------------------------------------------------------
def _fused_conv_norm_kernel(patch_ref, w_ref, o_ref, *, inv_hw):
    # patch_ref: (HW, tk) bf16/f32   w_ref: (tk, tn)   o_ref: (HW, tn) f32
    k = pl.program_id(2)
    prod = jnp.dot(patch_ref[...], w_ref[...], preferred_element_type=jnp.float32)

    @pl.when(k == 0)
    def _():
        o_ref[...] = prod          # write-on-first-step (no zero-fill pass)

    @pl.when(k != 0)
    def _():
        o_ref[...] += prod

    @pl.when(k == pl.num_programs(2) - 1)
    def _():
        y = o_ref[...]                                   # (HW, tn) fp32
        s = jnp.sum(y, axis=0, keepdims=True)            # (1, tn)
        ss = jnp.sum(y * y, axis=0, keepdims=True)       # (1, tn)
        mean = s * inv_hw
        var = jnp.maximum(ss * inv_hw - mean * mean, 0.0)
        yn = (y - mean) * jax.lax.rsqrt(var + EPS)
        o_ref[...] = jnp.maximum(yn, 0.0).astype(o_ref.dtype)


# --------------------------------------------------------------------------
# HW-tiled path, pass 1: conv matmul per (sample, cout-tile, hw-tile) plus
# per-tile partial statistics (sum / sum of squares).
# --------------------------------------------------------------------------
def _conv_stats_kernel(patch_ref, w_ref, y_ref, st_ref):
    # patch_ref: (thw, tk)   w_ref: (tk, tn)   y_ref: (thw, tn) f32
    # st_ref:    (8, tn) f32  -- row 0 = sum, row 1 = sum of squares
    k = pl.program_id(3)
    prod = jnp.dot(patch_ref[...], w_ref[...], preferred_element_type=jnp.float32)

    @pl.when(k == 0)
    def _():
        y_ref[...] = prod

    @pl.when(k != 0)
    def _():
        y_ref[...] += prod

    @pl.when(k == pl.num_programs(3) - 1)
    def _():
        y = y_ref[...]
        s = jnp.sum(y, axis=0, keepdims=True)
        ss = jnp.sum(y * y, axis=0, keepdims=True)
        st_ref[0:1, :] = s
        st_ref[1:2, :] = ss
        st_ref[2:8, :] = jnp.zeros((6, s.shape[1]), jnp.float32)


# --------------------------------------------------------------------------
# HW-tiled path, pass 2: normalize (precomputed mean / inv-std) + ReLU.
# --------------------------------------------------------------------------
def _norm_relu_kernel(y_ref, mv_ref, o_ref):
    # y_ref: (thw, tn) f32   mv_ref: (8, tn) f32 (row0=mean, row1=inv_std)
    mean = mv_ref[0:1, :]
    inv = mv_ref[1:2, :]
    o_ref[...] = jnp.maximum((y_ref[...] - mean) * inv, 0.0).astype(o_ref.dtype)


def downsample_forward(x, weight, bias=None, *, matmul_dtype=jnp.bfloat16,
                       max_fused_hw=2048, hw_tile=1024):
    """Conv2d(k=4, s=2, p=1) + InstanceNorm2d(affine=False) + ReLU.

    x: (N, Cin, H, W) float32.  weight: (Cout, Cin, 4, 4).  bias: (Cout,).
    `bias` is accepted for API parity but intentionally unused: InstanceNorm
    subtracts the per-channel mean right after the conv, so a per-channel
    bias cancels exactly and never affects the output.
    """
    del bias  # algebraic no-op under InstanceNorm(affine=False)

    N, Cin, H, W = x.shape
    Cout = weight.shape[0]
    KH = KW = 4
    stride = 2
    Ho, Wo = H // 2, W // 2
    HW = Ho * Wo
    K = Cin * KH * KW

    # --- im2col glue: (N, HW, K) lane-dense, cast to bf16 BEFORE the concat
    #     so the materialized patches array is half-width in HBM. ---
    x_nhwc = jnp.transpose(x, (0, 2, 3, 1)).astype(matmul_dtype)   # (N,H,W,Cin)
    xp = jnp.pad(x_nhwc, ((0, 0), (1, 1), (1, 1), (0, 0)))
    cols = []
    for kh in range(KH):
        for kw in range(KW):
            cols.append(xp[:, kh:kh + stride * Ho:stride,
                           kw:kw + stride * Wo:stride, :])          # (N,Ho,Wo,Cin)
    pat = jnp.concatenate(cols, axis=-1).reshape(N, HW, K)

    # weight -> (K, Cout), K ordered (kh, kw, cin) to match the patches.
    w_mat = (jnp.transpose(weight, (2, 3, 1, 0))
             .reshape(K, Cout).astype(matmul_dtype))

    # Pad contraction / output-channel dims to 128 for lane-dense MXU tiles
    # and unmasked output stores. Padded channels normalize to exactly 0.
    Kp = _round_up(K, 128)
    Cp = _round_up(Cout, 128)
    if Kp != K:
        pat = jnp.pad(pat, ((0, 0), (0, 0), (0, Kp - K)))
        w_mat = jnp.pad(w_mat, ((0, Kp - K), (0, 0)))
    if Cp != Cout:
        w_mat = jnp.pad(w_mat, ((0, 0), (0, Cp - Cout)))

    # Tile sizes: wider output tiles feed the 256-wide MXU on v6e/v7x and
    # halve redundant patch re-streaming; bigger tk cuts grid-step overhead.
    tn = 256 if Cp % 256 == 0 else 128
    if Kp % 512 == 0:
        tk = 512
    elif Kp % 256 == 0:
        tk = 256
    else:
        tk = 128

    vmem_limit = _vmem_limit_bytes()

    if HW <= max_fused_hw:
        # -------- fused single-kernel path (full HW resident) --------
        grid = (N, Cp // tn, Kp // tk)
        out = pl.pallas_call(
            functools.partial(_fused_conv_norm_kernel, inv_hw=1.0 / HW),
            out_shape=jax.ShapeDtypeStruct((N, HW, Cp), jnp.float32),
            grid_spec=pltpu.PrefetchScalarGridSpec(
                num_scalar_prefetch=0,
                grid=grid,
                in_specs=[
                    pl.BlockSpec((pl.Squeezed(), HW, tk),
                                 lambda n, c, k: (n, 0, k)),
                    pl.BlockSpec((tk, tn),
                                 lambda n, c, k: (k, c)),
                ],
                out_specs=pl.BlockSpec((pl.Squeezed(), HW, tn),
                                       lambda n, c, k: (n, 0, c)),
            ),
            compiler_params=pltpu.CompilerParams(
                dimension_semantics=("parallel", "parallel", "arbitrary"),
                vmem_limit_bytes=vmem_limit),
        )(pat, w_mat)
        out = out[:, :, :Cout]
    else:
        # -------- HW-tiled two-pass-norm path (large spatial sizes) --------
        thw = _round_up(min(hw_tile, _round_up(HW, 8)), 8)
        HWp = _round_up(HW, thw)
        if HWp != HW:
            # Zero rows: contribute 0 to sum/sumsq; sliced off afterwards.
            pat = jnp.pad(pat, ((0, 0), (0, HWp - HW), (0, 0)))
        n_hw = HWp // thw

        grid1 = (N, Cp // tn, n_hw, Kp // tk)
        conv_y, stats = pl.pallas_call(
            _conv_stats_kernel,
            out_shape=(jax.ShapeDtypeStruct((N, HWp, Cp), jnp.float32),
                       jax.ShapeDtypeStruct((N, n_hw, 8, Cp), jnp.float32)),
            grid_spec=pltpu.PrefetchScalarGridSpec(
                num_scalar_prefetch=0,
                grid=grid1,
                in_specs=[
                    pl.BlockSpec((pl.Squeezed(), thw, tk),
                                 lambda n, c, h, k: (n, h, k)),
                    pl.BlockSpec((tk, tn),
                                 lambda n, c, h, k: (k, c)),
                ],
                out_specs=(
                    pl.BlockSpec((pl.Squeezed(), thw, tn),
                                 lambda n, c, h, k: (n, h, c)),
                    pl.BlockSpec((pl.Squeezed(), pl.Squeezed(), 8, tn),
                                 lambda n, c, h, k: (n, h, 0, c)),
                ),
            ),
            compiler_params=pltpu.CompilerParams(
                dimension_semantics=("parallel", "parallel", "parallel",
                                     "arbitrary"),
                vmem_limit_bytes=vmem_limit),
        )(pat, w_mat)

        # Tiny XLA reduction of per-tile partial stats -> mean / inv-std
        # (biased variance over the TRUE HW count, padded rows contribute 0).
        sums = jnp.sum(stats[:, :, 0, :], axis=1)        # (N, Cp)
        sumsq = jnp.sum(stats[:, :, 1, :], axis=1)       # (N, Cp)
        mean = sums / HW
        var = jnp.maximum(sumsq / HW - mean * mean, 0.0)
        inv_std = jax.lax.rsqrt(var + EPS)
        mv = jnp.zeros((N, 8, Cp), jnp.float32)
        mv = mv.at[:, 0, :].set(mean).at[:, 1, :].set(inv_std)

        grid2 = (N, Cp // tn, n_hw)
        out = pl.pallas_call(
            _norm_relu_kernel,
            out_shape=jax.ShapeDtypeStruct((N, HWp, Cp), jnp.float32),
            grid_spec=pltpu.PrefetchScalarGridSpec(
                num_scalar_prefetch=0,
                grid=grid2,
                in_specs=[
                    pl.BlockSpec((pl.Squeezed(), thw, tn),
                                 lambda n, c, h: (n, h, c)),
                    pl.BlockSpec((pl.Squeezed(), 8, tn),
                                 lambda n, c, h: (n, 0, c)),
                ],
                out_specs=pl.BlockSpec((pl.Squeezed(), thw, tn),
                                       lambda n, c, h: (n, h, c)),
            ),
            compiler_params=pltpu.CompilerParams(
                dimension_semantics=("parallel", "parallel", "parallel"),
                vmem_limit_bytes=vmem_limit),
        )(conv_y, mv)
        out = out[:, :HW, :Cout]

    # (N, HW, Cout) -> (N, Cout, Ho, Wo)
    return out.reshape(N, Ho, Wo, Cout).transpose(0, 3, 1, 2)


def _reference_forward(x, weight, bias, matmul_dtype=jnp.bfloat16):
    """Pure-JAX reference.  Inputs/weights are quantized to the same matmul
    dtype as the kernel (fp32 accumulation), and the bias is included (which
    InstanceNorm cancels), so it must match the bias-free kernel closely."""
    y = jax.lax.conv_general_dilated(
        x.astype(matmul_dtype), weight.astype(matmul_dtype),
        window_strides=(2, 2), padding=((1, 1), (1, 1)),
        dimension_numbers=("NCHW", "OIHW", "NCHW"),
        preferred_element_type=jnp.float32)
    y = y + bias.reshape(1, -1, 1, 1)
    mean = jnp.mean(y, axis=(2, 3), keepdims=True)
    var = jnp.mean((y - mean) ** 2, axis=(2, 3), keepdims=True)
    y = (y - mean) * jax.lax.rsqrt(var + EPS)
    return jnp.maximum(y, 0.0)


if __name__ == "__main__":
    def _init(key, N, Cin, H, W, Cout):
        kx, kw, kb = jax.random.split(key, 3)
        x = jax.random.normal(kx, (N, Cin, H, W), dtype=jnp.float32)
        fan_in = Cin * 4 * 4
        bound = 1.0 / (fan_in ** 0.5)
        w = jax.random.uniform(kw, (Cout, Cin, 4, 4), minval=-bound,
                               maxval=bound, dtype=jnp.float32)
        b = jax.random.uniform(kb, (Cout,), minval=-bound, maxval=bound,
                               dtype=jnp.float32)
        return x, w, b

    key = jax.random.PRNGKey(0)
    k1, k2 = jax.random.split(key)

    # 1) Small shape -> fused single-kernel path (bf16 MXU, fp32 accumulate).
    x, w, b = _init(k1, 2, 4, 16, 16, 8)
    out = jax.block_until_ready(downsample_forward(x, w, b))
    ref = jax.block_until_ready(_reference_forward(x, w, b))
    assert out.shape == (2, 8, 8, 8), out.shape
    err = float(jnp.max(jnp.abs(out - ref)))
    assert err < 2e-3, err

    # 2) Force the HW-tiled two-pass-norm path (used for large spatial sizes
    #    on v7x); small shape here just to exercise/verify that code path.
    x2, w2, b2 = _init(k2, 2, 8, 32, 32, 16)
    out2 = jax.block_until_ready(
        downsample_forward(x2, w2, b2, max_fused_hw=64, hw_tile=128))
    ref2 = jax.block_until_ready(_reference_forward(x2, w2, b2))
    assert out2.shape == (2, 16, 16, 16), out2.shape
    err2 = float(jnp.max(jnp.abs(out2 - ref2)))
    assert err2 < 2e-3, err2

    print("KERNEL_OK")
</pallas_src>

<mosaic_0001>
module attributes {stable_mosaic.version = 11 : i64} {
  func.func @_fused_conv_norm_kernel(%arg0: i32, %arg1: i32, %arg2: i32, %arg3: memref<1x64x128xbf16, #tpu.memory_space<vmem>>, %arg4: memref<128x128xbf16, #tpu.memory_space<vmem>>, %arg5: memref<1x64x128xf32, #tpu.memory_space<vmem>>) attributes {dimension_semantics = [#tpu.dimension_semantics<parallel>, #tpu.dimension_semantics<parallel>, #tpu.dimension_semantics<arbitrary>], iteration_bounds = array<i64: 2, 1, 1>, scalar_prefetch = 0 : i64, scratch_operands = 0 : i64, tpu.core_type = #tpu.core_type<tc>, window_params = [{transform_indices = @transform_0, window_bounds = array<i64: 1, 64, 128>}, {transform_indices = @transform_1, window_bounds = array<i64: 128, 128>}, {transform_indices = @transform_2, window_bounds = array<i64: 1, 64, 128>}]} {
    %c0 = arith.constant 0 : index
    %c0_0 = arith.constant 0 : index
    %c0_1 = arith.constant 0 : index
    %0 = vector.load %arg3[%c0, %c0_0, %c0_1] : memref<1x64x128xbf16, #tpu.memory_space<vmem>>, vector<1x64x128xbf16>
    %1 = vector.shape_cast %0 : vector<1x64x128xbf16> to vector<64x128xbf16>
    %c0_2 = arith.constant 0 : index
    %c0_3 = arith.constant 0 : index
    %2 = vector.load %arg4[%c0_2, %c0_3] : memref<128x128xbf16, #tpu.memory_space<vmem>>, vector<128x128xbf16>
    %cst = arith.constant dense<0.000000e+00> : vector<64x128xf32>
    %3 = tpu.matmul %1, %2, %cst {dimension_numbers = #tpu.dot_dimension_numbers<[1], [0], [0], [1], [0, 0, 1, 1], [], []>} : vector<64x128xbf16>, vector<128x128xbf16>, vector<64x128xf32> -> vector<64x128xf32>
    %c0_i32 = arith.constant 0 : i32
    %4 = arith.cmpi eq, %arg2, %c0_i32 : i32
    %5 = arith.extui %4 : i1 to i32
    %c0_i32_4 = arith.constant 0 : i32
    %6 = arith.cmpi ne, %5, %c0_i32_4 : i32
    scf.if %6 {
      %c0_9 = arith.constant 0 : index
      %c0_10 = arith.constant 0 : index
      %c0_11 = arith.constant 0 : index
      %13 = vector.load %arg5[%c0_9, %c0_10, %c0_11] : memref<1x64x128xf32, #tpu.memory_space<vmem>>, vector<1x64x128xf32>
      %14 = vector.shape_cast %13 : vector<1x64x128xf32> to vector<64x128xf32>
      %15 = vector.shape_cast %3 : vector<64x128xf32> to vector<1x64x128xf32>
      tpu.vector_store %arg5[%c0_9, %c0_10, %c0_11], %15 {strides = array<i32>} : memref<1x64x128xf32, #tpu.memory_space<vmem>>, vector<1x64x128xf32>,
    } else {
    }
    %c0_i32_5 = arith.constant 0 : i32
    %7 = arith.cmpi ne, %arg2, %c0_i32_5 : i32
    %8 = arith.extui %7 : i1 to i32
    %c0_i32_6 = arith.constant 0 : i32
    %9 = arith.cmpi ne, %8, %c0_i32_6 : i32
    scf.if %9 {
      %c0_9 = arith.constant 0 : index
      %c0_10 = arith.constant 0 : index
      %c0_11 = arith.constant 0 : index
      %13 = vector.load %arg5[%c0_9, %c0_10, %c0_11] : memref<1x64x128xf32, #tpu.memory_space<vmem>>, vector<1x64x128xf32>
      %14 = vector.shape_cast %13 : vector<1x64x128xf32> to vector<64x128xf32>
      %15 = arith.addf %14, %3 : vector<64x128xf32>
      %c0_12 = arith.constant 0 : index
      %c0_13 = arith.constant 0 : index
      %c0_14 = arith.constant 0 : index
      %16 = vector.load %arg5[%c0_12, %c0_13, %c0_14] : memref<1x64x128xf32, #tpu.memory_space<vmem>>, vector<1x64x128xf32>
      %17 = vector.shape_cast %16 : vector<1x64x128xf32> to vector<64x128xf32>
      %18 = vector.shape_cast %15 : vector<64x128xf32> to vector<1x64x128xf32>
      tpu.vector_store %arg5[%c0_12, %c0_13, %c0_14], %18 {strides = array<i32>} : memref<1x64x128xf32, #tpu.memory_space<vmem>>, vector<1x64x128xf32>,
    } else {
    }
    %c0_i32_7 = arith.constant 0 : i32
    %10 = arith.cmpi eq, %arg2, %c0_i32_7 : i32
    %11 = arith.extui %10 : i1 to i32
    %c0_i32_8 = arith.constant 0 : i32
    %12 = arith.cmpi ne, %11, %c0_i32_8 : i32
    scf.if %12 {
      %c0_9 = arith.constant 0 : index
      %c0_10 = arith.constant 0 : index
      %c0_11 = arith.constant 0 : index
      %13 = vector.load %arg5[%c0_9, %c0_10, %c0_11] : memref<1x64x128xf32, #tpu.memory_space<vmem>>, vector<1x64x128xf32>
      %14 = vector.shape_cast %13 : vector<1x64x128xf32> to vector<64x128xf32>
      %cst_12 = arith.constant dense<0.000000e+00> : vector<128xf32>
      %15 = vector.multi_reduction <add>, %14, %cst_12 [0] : vector<64x128xf32> to vector<128xf32>
      %16 = vector.shape_cast %15 : vector<128xf32> to vector<1x128xf32>
      %17 = arith.mulf %14, %14 : vector<64x128xf32>
      %cst_13 = arith.constant dense<0.000000e+00> : vector<128xf32>
      %18 = vector.multi_reduction <add>, %17, %cst_13 [0] : vector<64x128xf32> to vector<128xf32>
      %19 = vector.shape_cast %18 : vector<128xf32> to vector<1x128xf32>
      %cst_14 = arith.constant 1.562500e-02 : f32
      %20 = vector.broadcast %cst_14 : f32 to vector<1x128xf32>
      %21 = arith.mulf %16, %20 : vector<1x128xf32>
      %cst_15 = arith.constant 1.562500e-02 : f32
      %22 = vector.broadcast %cst_15 : f32 to vector<1x128xf32>
      %23 = arith.mulf %19, %22 : vector<1x128xf32>
      %24 = arith.mulf %21, %21 : vector<1x128xf32>
      %25 = arith.subf %23, %24 : vector<1x128xf32>
      %cst_16 = arith.constant 0.000000e+00 : f32
      %26 = vector.broadcast %cst_16 : f32 to vector<1x128xf32>
      %27 = arith.maximumf %25, %26 : vector<1x128xf32>
      %28 = vector.broadcast %21 : vector<1x128xf32> to vector<64x128xf32>
      %29 = arith.subf %14, %28 : vector<64x128xf32>
      %cst_17 = arith.constant 9.99999974E-6 : f32
      %30 = vector.broadcast %cst_17 : f32 to vector<1x128xf32>
      %31 = arith.addf %27, %30 : vector<1x128xf32>
      %32 = math.rsqrt %31 : vector<1x128xf32>
      %33 = vector.broadcast %32 : vector<1x128xf32> to vector<64x128xf32>
      %34 = arith.mulf %29, %33 : vector<64x128xf32>
      %cst_18 = arith.constant 0.000000e+00 : f32
      %35 = vector.broadcast %cst_18 : f32 to vector<64x128xf32>
      %36 = arith.maximumf %34, %35 : vector<64x128xf32>
      %c0_19 = arith.constant 0 : index
      %c0_20 = arith.constant 0 : index
      %c0_21 = arith.constant 0 : index
      %37 = vector.load %arg5[%c0_19, %c0_20, %c0_21] : memref<1x64x128xf32, #tpu.memory_space<vmem>>, vector<1x64x128xf32>
      %38 = vector.shape_cast %37 : vector<1x64x128xf32> to vector<64x128xf32>
      %39 = vector.shape_cast %36 : vector<64x128xf32> to vector<1x64x128xf32>
      tpu.vector_store %arg5[%c0_19, %c0_20, %c0_21], %39 {strides = array<i32>} : memref<1x64x128xf32, #tpu.memory_space<vmem>>, vector<1x64x128xf32>,
    } else {
    }
    return
  }
  func.func @transform_0(%arg0: i32, %arg1: i32, %arg2: i32) -> (i32, i32, i32) {
    %c0_i32 = arith.constant 0 : i32
    %c0_i32_0 = arith.constant 0 : i32
    return %arg0, %c0_i32, %arg2 : i32, i32, i32
  }
  func.func @transform_1(%arg0: i32, %arg1: i32, %arg2: i32) -> (i32, i32) {
    %c0_i32 = arith.constant 0 : i32
    return %arg2, %arg1 : i32, i32
  }
  func.func @transform_2(%arg0: i32, %arg1: i32, %arg2: i32) -> (i32, i32, i32) {
    %c0_i32 = arith.constant 0 : i32
    %c0_i32_0 = arith.constant 0 : i32
    return %arg0, %c0_i32, %arg1 : i32, i32, i32
  }
}

</mosaic_0001>

<bundles_post_ra>
// kernel: tpu_custom_call.1
= control target key start
LH: loop header
LB: loop body
LE: loop exit
PB: predicated region body
PF: predicated region fallthrough
CT: control target
= control target key end

     0   :  { %7 = vsyncpa [#allocation3], 0  ;;  %s1214_s0 = inlined_call_operand.hbm [shape: bf16[2,64,128], index: 0, kind: input, shape index: {}]   ;;  %s1215_s1 = inlined_call_operand.hbm [shape: bf16[128,128], index: 1, kind: input, shape index: {}]   ;;  %s1216_s2 = inlined_call_operand.hbm [shape: f32[2,64,128], index: 2, kind: output, shape index: {}]  }
   0x1   :  { %9 = vsyncpa [#allocation3 + $0x1], 0 }
   0x2   :  { %10 = vsyncpa [#allocation6], 0 }
   0x3   :  { %11 = vsyncpa [#allocation4], 0 }
   0x4   :  { %13 = vsyncpa [#allocation4 + $0x1], 0  ;;  %s958_s9 = smov 0   ;;  %s960_s10 = smov 0  }
   0x5   :  { %s962_s11 = smov 0   ;;  %s964_s12 = smov 0  }
   0x6   :  { %s966_s13 = smov 0   ;;  %s968_s14 = smov 0  }
   0x7 LB: > { %s616_s15 = sadd.s32 4294967295, %s934_s14   ;;  %s617_s16 = sadd.s32 4294967294, %s934_s14   ;;  %s934_s14 = sphi %s968_s14, %s19_s14   ;;  %s930_s13 = sphi %s966_s13, %s1240_s13   ;;  %s926_s12 = sphi %s964_s12, %s1239_s12   ;;  %s922_s11 = sphi %s962_s11, %s1238_s11   ;;  %s918_s10 = sphi %s960_s10, %s1237_s10   ;;  %s914_s9 = sphi %s958_s9, %s1236_s9  }
   0x8   : > { %p60_p0 = scmp.ne.s32.totalorder %s918_s10, %s914_s9  ;;  %p992_p1 = scmp.eq.s32.totalorder %s616_s15, 0 }
   0x9   : > { %p996_p2 = scmp.eq.s32.totalorder %s616_s15, 1  ;;  %p120_p3 = scmp.eq.s32.totalorder %s617_s16, 1 }
   0xa   : > { %s1221_s17 = scalar_select %p992_p1, 1, 0 }
   0xb   : > { %s1222_s18 = scalar_select %p996_p2, 1, 0 }
   0xc   : > { %p1002_p4 = por %p992_p1, %p60_p0  ;;  %p618_p5 = scmp.ge.s32.totalorder %s934_s14, 1 }
   0xd   : > { %p1007_p6 = por %p120_p3, %p60_p0  ;;  %p127_p7 = scmp.lt.s32.totalorder %s934_s14, 3 }
   0xe   : > { %s1223_s19 = scalar_select %p1002_p4, 1, 0 }
   0xf   : > { %s1224_s20 = scalar_select %p1007_p6, 1, 0 }
  0x10   : > { %p1012_p8 = pnand %p618_p5, %p127_p7  ;;  %s936_s22 = smov [#allocation5]  }
  0x11   : > { %s143_s23 = sshll.u32 %s936_s22, 4  ;;  %s38_s25 = sadd.s32 1, %s930_s13  ;;  %s144_s23 = int_to_ptr.vmem [resolvable:$true] %s143_s23 }
  0x12   : > { %s1225_s21 = scalar_select %p1012_p8, 1, 0 }
  0x13   : > { %p707_p9 = pneg %p1012_p8  ;;  %s790_s28 = scalar_lea.hbm %s1215_s1, 1024 }
  0x14   : > { %p791_p12 = scmp.ne.s32.totalorder %s1215_s1, %s790_s28  ;;  %p797_p5 = scmp.lt.u32.totalorder %s790_s28, %s1215_s1 }
  0x15   : > { %p1021_p11 = pnand %p707_p9, %p992_p1 }
  0x17   : > { %p792_p13 = pneg %p1021_p11 }
  0x19   : > { %p793_p0 = pnand %p792_p13, %p791_p12 }
  0x1b   : > { %p794_p3 = pneg %p793_p0 }
  0x1d   : > { %p799_p7 = pnand %p797_p5, %p794_p3 }
  0x1f   : > { %802 = shalt.err (!%p799_p7)
}
  0x20   : > { %s803_s5 = scalar_lea.vmem %s144_s23, 1024  ;;  %p811_p1 = scmp.lt.s32.totalorder %s144_s23, %s144_s23 }
  0x21   : > { %p804_p9 = scmp.ne.s32.totalorder %s144_s23, %s803_s5  ;;  %p812_p4 = scmp.lt.s32.totalorder %s803_s5, %s803_s5 }
  0x23   : > { %p806_p10 = pnand %p804_p9, %p792_p13  ;;  %p813_p8 = por %p812_p4, %p811_p1 }
  0x25   : > { %p807_p6 = pneg %p806_p10 }
  0x27   : > { %p814_p2 = pnand %p813_p8, %p807_p6 }
  0x29   : > { %817 = shalt.err (!%p814_p2)
}
  0x2a   : > { %s937_s6 = smov 64   ;;  %s938_s7 = smov 4  }
  0x2b   : > { %710 = dma.hbm_to_vmem [thread:$0]  (!%p1021_p11), %s1215_s1, 1024, %s144_s23, [#allocation6], %s937_s6, %s937_s6, %s938_s7  }
  0x2c   : > { %p40_p1 = scmp.ge.s32.totalorder %s38_s25, 2  ;;  %s47_s16 = sadd.s32 1, %s922_s11 }
  0x2d   : > { %p54_p2 = scmp.ne.s32.totalorder %s922_s11, %s918_s10  ;;  %p55_p4 = scmp.eq.s32.totalorder %s934_s14, 0 }
  0x2e   : > { %s1242_s25 = smov (%p40_p1, %s38_s25), 0  ;;  %p1228_p8 = scmp.ne.s32.totalorder %s1222_s18, 0 }
  0x2f   : > { %p1051_p6 = por %p55_p4, %p54_p2  ;;  %s42_s26 = ssub.s32 %s930_s13, %s1242_s25 }
  0x30   : > { %p1057_p10 = por %p1228_p8, %p54_p2  ;;  %p720_p12 = scmp.lt.s32.totalorder %s934_s14, 2 }
  0x31   : > { %p45_p11 = scmp.eq.s32.totalorder %s42_s26, 0  ;;  %s157_s23 = sand.u32 1, %s922_s11  }
  0x32   : > { %s621_s27 = sshll.u32 %s157_s23, 5  ;;  %s645_s29 = sshll.u32 %s930_s13, 9 }
  0x33   : > { %s1066_s28 = scalar_select %p45_p11, %s922_s11, %s47_s16  }
  0x34   : > { %s1072_s4 = scalar_lea.hbm %s1214_s0, %s645_s29  ;;  %s161_s18 = scalar_lea.vmem [#allocation2], %s621_s27 }
  0x35   : > { %s169_s5 = sshll.u32 %s161_s18, 4  ;;  %p1078_p13 = pnand %p720_p12, %p1051_p6  ;;  %s1074_s5 = int_to_ptr.vmem [resolvable:$true] %s169_s5 }
  0x36   : > { %s1082_s15 = scalar_lea.sflag [#allocation3], %s157_s23  ;;  %s818_s16 = scalar_lea.hbm %s1072_s4, 512 }
  0x37   : > { %p819_p0 = scmp.ne.s32.totalorder %s1072_s4, %s818_s16  ;;  %p820_p3 = pneg %p1078_p13 }
  0x38   : > { %s823_s22 = scalar_lea.hbm %s1214_s0, 1024  ;;  %p824_p9 = scmp.lt.u32.totalorder %s1072_s4, %s1214_s0 }
  0x39   : > { %p821_p5 = pnand %p820_p3, %p819_p0  ;;  %p825_p1 = scmp.lt.u32.totalorder %s823_s22, %s818_s16 }
  0x3a   : > { %p827_p4 = scmp.lt.u32.totalorder %s818_s16, %s1072_s4 }
  0x3b   : > { %p822_p7 = pneg %p821_p5  ;;  %p826_p2 = por %p825_p1, %p824_p9 }
  0x3d   : > { %p828_p6 = por %p827_p4, %p826_p2 }
  0x3f   : > { %p829_p8 = pnand %p828_p6, %p822_p7 }
  0x41   : > { %832 = shalt.err (!%p829_p8)
}
  0x42   : > { %s833_s23 = scalar_lea.vmem %s1074_s5, 512  ;;  %s939_s3 = smov [#allocation2]  }
  0x43   : > { %p834_p12 = scmp.ne.s32.totalorder %s1074_s5, %s833_s23  ;;  %s838_s18 = sshll.u32 %s939_s3, 4  ;;  %s839_s18 = int_to_ptr.vmem [resolvable:$false] %s838_s18 }
  0x44   : > { %s840_s26 = scalar_lea.vmem %s839_s18, 1024  ;;  %p841_p5 = scmp.lt.s32.totalorder %s1074_s5, %s839_s18 }
  0x45   : > { %p836_p11 = pnand %p834_p12, %p820_p3  ;;  %p842_p9 = scmp.lt.s32.totalorder %s840_s26, %s833_s23 }
  0x47   : > { %p837_p0 = pneg %p836_p11  ;;  %p843_p1 = por %p842_p9, %p841_p5 }
  0x49   : > { %p844_p2 = pnand %p843_p1, %p837_p0 }
  0x4b   : > { %847 = shalt.err (!%p844_p2)
}
  0x4c   : > { %714 = dma.hbm_to_vmem [thread:$0]  (!%p1078_p13), %s1072_s4, 512, %s1074_s5, %s1082_s15, %s937_s6, %s937_s6, %s938_s7  }
  0x4d   : > { %p1231_p3 = scmp.ne.s32.totalorder %s1225_s21, 0 }
  0x4e   : > { %s1116_s16 = sand.u32 (!%p1231_p3), 1, %s918_s10   ;;  %p1232_p7 = scmp.ne.s32.totalorder (!%p1231_p3), %s1223_s19, 0 }
  0x4f   : > { %181 = sbr.rel (%p1231_p3) target bundleno = 407 (0x197), region = 28  ;;  %s625_s27 = sshll.u32 (!%p1231_p3), %s1116_s16, 5 }
  0x50   : > { %s184_s22 = scalar_lea.sflag (!%p1231_p3), [#allocation3], %s1116_s16  ;;  %s1120_s29 = scalar_lea.vmem (!%p1231_p3), [#allocation2], %s625_s27 }
  0x56   : > { %901 = dma.done.wait (%p1232_p7), %s184_s22, 512  }
  0x57   : > { %903 = vsyncadd (%p1232_p7), %s184_s22, 4294966784  ;;  %p1233_p13 = scmp.ne.s32.totalorder %s1221_s17, 0 }
  0x59   : > { %905 = dma.done.wait (%p1233_p13), [#allocation6], 1024  }
  0x5a   : > { %907 = vsyncadd (%p1233_p13), [#allocation6], 4294966272  ;;  %v776_v0 = vld [vmem:[#allocation5] sm:$0xff]   ;;  %v777_v1 = vld [vmem:[#allocation5 + $0x8] sm:$0xff]   ;;  %s627_s17 = sshll.u32 %s1116_s16, 6  ;;  %s646_s19 = sshll.u32 %s926_s12, 10 }
  0x5b   : > { %659 = vmatprep.subr.bf16.mxu0 %v776_v0  ;;  %683 = vmatprep.subr.bf16.mxu1 %v776_v0  ;;  %v778_v2 = vld [vmem:[#allocation5 + $0x10] sm:$0xff]   ;;  %v779_v3 = vld [vmem:[#allocation5 + $0x18] sm:$0xff]   ;;  %v784_v4 = vld [vmem:[%s1120_s29] sm:$0xff]   ;;  %s211_s21 = scalar_lea.vmem [#allocation7], %s627_s17  ;;  %s1163_s5 = scalar_lea.hbm %s1216_s2, %s646_s19 }
  0x5c   : > { %660 = vmatpush3.bf16.msra.mxu0 %v776_v0  ;;  %691 = vmatpush3.bf16.msra.mxu1 %v776_v0  ;;  %v786_v5 = vld [vmem:[%s1120_s29 + $0x10] sm:$0xff]   ;;  %v780_v6 = vld [vmem:[#allocation5 + $0x20] sm:$0xff]   ;;  %v781_v7 = vld [vmem:[#allocation5 + $0x28] sm:$0xff]   ;;  %s514_s6 = sshll.u32 %s211_s21, 4  ;;  %s500_s12 = scalar_lea.sflag [#allocation4], %s1116_s16  ;;  %s1165_s6 = int_to_ptr.vmem [resolvable:$true] %s514_s6 }
  0x5d   : > { %661 = vmatprep.subr.bf16.mxu0 %v777_v1  ;;  %684 = vmatprep.subr.bf16.mxu1 %v777_v1  ;;  %v782_v8 = vld [vmem:[#allocation5 + $0x30] sm:$0xff]   ;;  %v783_v9 = vld [vmem:[#allocation5 + $0x38] sm:$0xff]   ;;  %v785_v10 = vld [vmem:[%s1120_s29 + $0x8] sm:$0xff]   ;;  %s848_s8 = scalar_lea.vmem %s1165_s6, 1024  ;;  %s940_s15 = smov [#allocation7]  }
  0x5e   : > { %675 = vmatprep.mubr.bf16.mxu0 %v784_v4  ;;  %679 = vmatprep.mubr.bf16.mxu1 %v786_v5  ;;  %v787_v11 = vld [vmem:[%s1120_s29 + $0x18] sm:$0xff]   ;;  %p849_p4 = scmp.ne.s32.totalorder %s1165_s6, %s848_s8  ;;  %s852_s30 = sshll.u32 %s940_s15, 4  ;;  %s853_s30 = int_to_ptr.vmem [resolvable:$false] %s852_s30 }
  0x5f   : > { %s854_s23 = scalar_lea.vmem %s853_s30, 2048  ;;  %p855_p12 = scmp.lt.s32.totalorder %s1165_s6, %s853_s30 }
  0x60   : > { %662 = vmatpush3.bf16.msra.mxu0 %v777_v1  ;;  %692 = vmatpush3.bf16.msra.mxu1 %v777_v1  ;;  %p850_p6 = pnand %p849_p4, %p1057_p10  ;;  %p856_p11 = scmp.lt.s32.totalorder %s854_s23, %s848_s8 }
  0x61   : > { %663 = vmatprep.subr.bf16.mxu0 %v778_v2  ;;  %685 = vmatprep.subr.bf16.mxu1 %v778_v2 }
  0x62   : > { %p851_p8 = pneg %p850_p6  ;;  %p857_p0 = por %p856_p11, %p855_p12 }
  0x64   : > { %664 = vmatpush3.bf16.msra.mxu0 %v778_v2  ;;  %693 = vmatpush3.bf16.msra.mxu1 %v778_v2  ;;  %p858_p5 = pnand %p857_p0, %p851_p8 }
  0x65   : > { %665 = vmatprep.subr.bf16.mxu0 %v779_v3  ;;  %686 = vmatprep.subr.bf16.mxu1 %v779_v3 }
  0x68   : > { %666 = vmatpush3.bf16.msra.mxu0 %v779_v3  ;;  %694 = vmatpush3.bf16.msra.mxu1 %v779_v3 }
  0x69   : > { %667 = vmatprep.subr.bf16.mxu0 %v780_v6  ;;  %687 = vmatprep.subr.bf16.mxu1 %v780_v6 }
  0x6c   : > { %668 = vmatpush3.bf16.msra.mxu0 %v780_v6  ;;  %695 = vmatpush3.bf16.msra.mxu1 %v780_v6 }
  0x6d   : > { %669 = vmatprep.subr.bf16.mxu0 %v781_v7  ;;  %688 = vmatprep.subr.bf16.mxu1 %v781_v7 }
  0x70   : > { %670 = vmatpush3.bf16.msra.mxu0 %v781_v7  ;;  %696 = vmatpush3.bf16.msra.mxu1 %v781_v7 }
  0x71   : > { %671 = vmatprep.subr.bf16.mxu0 %v782_v8  ;;  %689 = vmatprep.subr.bf16.mxu1 %v782_v8 }
  0x74   : > { %672 = vmatpush3.bf16.msra.mxu0 %v782_v8  ;;  %697 = vmatpush3.bf16.msra.mxu1 %v782_v8 }
  0x75   : > { %673 = vmatprep.subr.bf16.mxu0 %v783_v9  ;;  %690 = vmatprep.subr.bf16.mxu1 %v783_v9 }
  0x78   : > { %674 = vmatpush3.bf16.msra.mxu0 %v783_v9  ;;  %698 = vmatpush3.bf16.msra.mxu1 %v783_v9 }
  0x7b   : > { %676 = vmatmul.mubr.bf16.vlgmr.msra.gmra.mrb[0].mxu0 %v785_v10  ;;  %680 = vmatmul.mubr.bf16.vlgmr.msra.gmra.mrb[0].mxu1 %v787_v11 }
 0x14e   : > { %v1134_v12 = vpop.f32.mrb[0].mxu0  ;;  %v1136_v13 = vpop.f32.mrb[0].mxu1 }
 0x14f   : > { %v344_v14 = vpop.f32.mrb[1].mxu0  ;;  %v1138_v15 = vpop.f32.mrb[1].mxu1  ;;  %v441_v24 = vmul.f32 %v1134_v12, %v1134_v12  ;;  %v445_v36 = vmul.f32 %v1136_v13, %v1136_v13 }
 0x150   : > { %v678_v16 = vpop.f32.mrb[2].mxu0  ;;  %v1140_v17 = vpop.f32.mrb[2].mxu1  ;;  %v439_v21 = vmul.f32 %v344_v14, %v344_v14  ;;  %v443_v28 = vmul.f32 %v1138_v15, %v1138_v15 }
 0x151   : > { %v347_v18 = vpop.f32.mrb[3].mxu0  ;;  %v363_v19 = vpop.f32.mrb[3].mxu1  ;;  %v442_v27 = vmul.f32 %v678_v16, %v678_v16  ;;  %v446_v39 = vmul.f32 %v1140_v17, %v1140_v17 }
 0x152   : > { %v426_v20 = vadd.f32 %v347_v18, %v344_v14  ;;  %v440_v22 = vmul.f32 %v347_v18, %v347_v18  ;;  %v444_v33 = vmul.f32 %v363_v19, %v363_v19 }
 0x154   : > { %v427_v23 = vadd.f32 %v1134_v12, %v426_v20  ;;  %v447_v25 = vadd.f32 %v440_v22, %v439_v21 }
 0x156   : > { %v428_v26 = vadd.f32 %v678_v16, %v427_v23  ;;  %v448_v29 = vadd.f32 %v447_v25, %v441_v24 }
 0x158   : > { %v429_v30 = vadd.f32 %v428_v26, %v1138_v15  ;;  %v449_v31 = vadd.f32 %v448_v29, %v442_v27 }
 0x15a   : > { %v430_v32 = vadd.f32 %v429_v30, %v363_v19  ;;  %v450_v34 = vadd.f32 %v449_v31, %v443_v28 }
 0x15c   : > { %v431_v35 = vadd.f32 %v1136_v13, %v430_v32  ;;  %v451_v37 = vadd.f32 %v450_v34, %v444_v33 }
 0x15e   : > { %v432_v38 = vadd.f32 %v1140_v17, %v431_v35  ;;  %v452_v40 = vadd.f32 %v451_v37, %v445_v36 }
 0x160   : > { %v433_v41 = vrot.slane %v432_v38, 4  ;;  %v453_v42 = vadd.f32 %v452_v40, %v446_v39 }
 0x162   : > { %v434_v43 = vadd.f32 %v433_v41, %v432_v38  ;;  %v454_v44 = vrot.slane %v453_v42, 4 }
 0x164   : > { %v435_v45 = vrot.slane %v434_v43, 2  ;;  %v455_v46 = vadd.f32 %v454_v44, %v453_v42 }
 0x166   : > { %v436_v47 = vadd.f32 %v435_v45, %v434_v43  ;;  %v456_v48 = vrot.slane %v455_v46, 2 }
 0x168   : > { %v437_v49 = vrot.slane %v436_v47, 1  ;;  %v457_v50 = vadd.f32 %v456_v48, %v455_v46 }
 0x16a   : > { %v438_v51 = vadd.f32 %v437_v49, %v436_v47  ;;  %v458_v52 = vrot.slane %v457_v50, 1 }
 0x16c   : > { %v459_v53 = vadd.f32 %v458_v52, %v457_v50  ;;  %v460_v54 = vmul.f32 0.015625, %v438_v51 }
 0x16e   : > { %v461_v55 = vmul.f32 0.015625, %v459_v53  ;;  %v462_v56 = vmul.f32 %v460_v54, %v460_v54  ;;  %v465_v57 = vsub.f32 %v344_v14, %v460_v54  ;;  %v466_v58 = vsub.f32 %v347_v18, %v460_v54 }
 0x16f   : > { %v467_v59 = vsub.f32 %v1134_v12, %v460_v54  ;;  %v468_v60 = vsub.f32 %v678_v16, %v460_v54  ;;  %v469_v61 = vsub.f32 %v1138_v15, %v460_v54  ;;  %v470_v62 = vsub.f32 %v363_v19, %v460_v54 }
 0x170   : > { %v463_v63 = vsub.f32 %v461_v55, %v462_v56  ;;  %v471_v0 = vsub.f32 %v1136_v13, %v460_v54  ;;  %v472_v1 = vsub.f32 %v1140_v17, %v460_v54 }
 0x172   : > { %v464_v2 = vmax.f32 %v463_v63, 0.0 }
 0x174   : > { %v473_v3 = vadd.f32 1e-05, %v464_v2 }
 0x176   : > { %788 = vrsqrt.f32 %v473_v3 }
 0x180   : > { %v789_v4 = vpop.eup %788 }
 0x181   : > { %v475_v5 = vmul.f32 %v789_v4, %v465_v57  ;;  %v476_v6 = vmul.f32 %v789_v4, %v466_v58  ;;  %v477_v7 = vmul.f32 %v789_v4, %v467_v59  ;;  %v478_v8 = vmul.f32 %v789_v4, %v468_v60 }
 0x182   : > { %v479_v9 = vmul.f32 %v789_v4, %v469_v61  ;;  %v480_v10 = vmul.f32 %v789_v4, %v470_v62  ;;  %v481_v11 = vmul.f32 %v789_v4, %v471_v0  ;;  %v482_v12 = vmul.f32 %v789_v4, %v472_v1 }
 0x183   : > { %v483_v14 = vmax.f32 %v475_v5, 0.0  ;;  %v484_v13 = vmax.f32 %v476_v6, 0.0  ;;  %v485_v15 = vmax.f32 %v477_v7, 0.0  ;;  %v486_v16 = vmax.f32 %v478_v8, 0.0 }
 0x184   : > { %v487_v17 = vmax.f32 %v479_v9, 0.0  ;;  %v488_v18 = vmax.f32 %v480_v10, 0.0  ;;  %v489_v19 = vmax.f32 %v481_v11, 0.0  ;;  %v490_v20 = vmax.f32 %v482_v12, 0.0 }
 0x185   : > { %491 = vst [vmem:[%s211_s21] sm:$0xff] %v483_v14  ;;  %492 = vst [vmem:[%s211_s21 + $0x8] sm:$0xff] %v484_v13 }
 0x186   : > { %493 = vst [vmem:[%s211_s21 + $0x10] sm:$0xff] %v485_v15  ;;  %494 = vst [vmem:[%s211_s21 + $0x18] sm:$0xff] %v486_v16 }
 0x187   : > { %495 = vst [vmem:[%s211_s21 + $0x20] sm:$0xff] %v487_v17  ;;  %496 = vst [vmem:[%s211_s21 + $0x28] sm:$0xff] %v488_v18 }
 0x188   : > { %497 = vst [vmem:[%s211_s21 + $0x30] sm:$0xff] %v489_v19  ;;  %498 = vst [vmem:[%s211_s21 + $0x38] sm:$0xff] %v490_v20 }
 0x189   : > { %861 = shalt.err (!%p858_p5)
}
 0x18a   : > { %s862_s3 = scalar_lea.hbm %s1163_s5, 1024  ;;  %s866_s27 = scalar_lea.hbm %s1216_s2, 2048 }
 0x18b   : > { %p863_p9 = scmp.ne.s32.totalorder %s1163_s5, %s862_s3  ;;  %p867_p3 = scmp.lt.u32.totalorder %s1163_s5, %s1216_s2 }
 0x18c   : > { %p868_p7 = scmp.lt.u32.totalorder %s866_s27, %s862_s3  ;;  %p870_p4 = scmp.lt.u32.totalorder %s862_s3, %s1163_s5 }
 0x18d   : > { %p864_p1 = pnand %p863_p9, %p1057_p10 }
 0x18e   : > { %p869_p13 = por %p868_p7, %p867_p3 }
 0x18f   : > { %p865_p2 = pneg %p864_p1 }
 0x190   : > { %p871_p6 = por %p870_p4, %p869_p13 }
 0x192   : > { %p872_p8 = pnand %p871_p6, %p865_p2 }
 0x194   : > { %875 = shalt.err (!%p872_p8)
}
 0x195   : > { %s941_s17 = smov 128   ;;  %s942_s19 = smov 8  }
 0x196   : > { %705 = dma.vmem_to_hbm [thread:$0]  (%p1057_p10), %s1165_s6, 1024, %s1163_s5, %s500_s12, %s941_s17, %s941_s17, %s942_s19  }
 0x197 PF: > { %s529_s21 = sand.u32 1, %s914_s9   ;;  %p1234_p12 = scmp.ne.s32.totalorder %s1224_s20, 0 }
 0x198   : > { %p1235_p11 = scmp.ge.s32.totalorder %s934_s14, 2  ;;  %s530_s7 = scalar_lea.sflag [#allocation4], %s529_s21 }
 0x19a   : > { %p716_p0 = pnand %p1235_p11, %p1234_p12 }
 0x19c   : > { %909 = dma.done.wait (!%p716_p0), %s530_s7, 1024  }
 0x19d   : > { %911 = vsyncadd (!%p716_p0), %s530_s7, 4294966272  ;;  %s19_s14 = sadd.s32 1, %s934_s14   ;;  %s1236_s9 = smov %s918_s10 }
 0x19e   : > { %p16_p5 = scmp.ge.s32.totalorder %s19_s14, 4   ;;  %s1237_s10 = smov %s922_s11 }
 0x19f   : > { %s1238_s11 = smov %s1066_s28  ;;  %s1239_s12 = smov %s930_s13 }
 0x1a0   : > { %s1240_s13 = smov %s1242_s25  ;;  %18 = sbr.rel (!%p16_p5) target bundleno = 7 (0x7), region = 90 }
 0x1a7   :  { %535 = vsyncpa [#allocation3], 1 }
 0x1a8   :  { %537 = vsyncpa [#allocation3 + $0x1], 1 }
 0x1a9   :  { %538 = vsyncpa [#allocation6], 1 }
 0x1aa   :  { %539 = vsyncpa [#allocation4], 1 }
 0x1ab   :  { %541 = vsyncpa [#allocation4 + $0x1], 1 }

</bundles_post_ra>
